<compile_context>
chip_gen: v7x
topology: tpu7x:2x2x1
jax: 0.10.0
libtpu: 0.0.40
codegen_flags: <defaults>
</compile_context>

<pallas_src>
from functools import partial

import jax
import jax.numpy as jnp
from jax.experimental import pallas as pl
from jax.experimental.pallas import tpu as pltpu


def _se_kernel(x_ref, w1t_ref, b1_ref, w2t_ref, b2_ref, o_ref, *, inv_hw):
    # x_ref: (Nb, C, HW) block in the input's native dtype.
    x = x_ref[...]                                                    # (Nb, C, HW)

    # adaptive_avg_pool2d(x, (1,1)) == mean over spatial; f32 accumulation
    # without materializing an f32 copy of the block.
    pooled = jnp.sum(x, axis=-1, dtype=jnp.float32) * inv_hw          # (Nb, C)

    # fc1 (1x1 conv expand_c -> squeeze_c): (Nb, C) @ (C, S) + b1, then SiLU.
    s = jnp.dot(pooled, w1t_ref[...],
                preferred_element_type=jnp.float32) + b1_ref[...]     # (Nb, S)
    s = s * jax.nn.sigmoid(s)

    # fc2 (1x1 conv squeeze_c -> expand_c): (Nb, S) @ (S, C) + b2, then sigmoid.
    g = jnp.dot(s, w2t_ref[...],
                preferred_element_type=jnp.float32) + b2_ref[...]     # (Nb, C)
    scale = jax.nn.sigmoid(g)                                         # (Nb, C)

    # Gate the input in its native dtype (broadcast over spatial).
    o_ref[...] = scale.astype(x.dtype)[:, :, None] * x


def _vmem_budget_and_cores():
    """Return (vmem_limit_bytes, two_tensorcores) for the current chip."""
    try:
        vmem = int(pltpu.get_tpu_info().vmem_capacity_bytes)
    except Exception:
        vmem = 64 << 20                    # conservative fallback (v7x per-TC)
    if vmem >= (100 << 20):                # v5e / v6e: 128 MiB VMEM, 1 TC/chip
        return 96 << 20, False
    return 48 << 20, True                  # v7x: 64 MiB VMEM, 2 TCs/chip


def _pick_nb(n, per_n_bytes, target_bytes, two_cores):
    """Batch elements per grid step (cdiv grid — Nb need not divide N)."""
    cap = max(1, int(target_bytes) // max(per_n_bytes, 1))
    nb = max(1, min(cap, n))
    if two_cores and n >= 2:
        # Keep >= 2 grid steps so the "parallel" axis shards across both TCs,
        # and prefer an even step count so the cores get balanced work.
        nb = min(nb, (n + 1) // 2)
        for cand in range(nb, max(0, nb - 8), -1):
            if pl.cdiv(n, cand) % 2 == 0:
                nb = cand
                break
    return nb


def squeeze_excitation(x_nchw, w1, b1, w2, b2):
    """x_nchw: (N, C, H, W);  w1: (S, C), b1: (S, 1);  w2: (C, S), b2: (C, 1)."""
    N, C, H, W = x_nchw.shape
    S = w1.shape[0]
    HW = H * W

    # No spatial padding: BlockSpec last dims equal the full array dims.
    x = x_nchw.reshape(N, C, HW)

    # Pre-transpose + cast weights once in the wrapper (constant index_map ->
    # single DMA; no per-step casts in the kernel body).
    w1_t = jnp.transpose(w1).astype(jnp.float32)      # (C, S)
    w2_t = jnp.transpose(w2).astype(jnp.float32)      # (S, C)
    b1_r = b1.reshape(1, S).astype(jnp.float32)
    b2_r = b2.reshape(1, C).astype(jnp.float32)

    vmem_limit, two_cores = _vmem_budget_and_cores()
    itemsize = jnp.dtype(x.dtype).itemsize
    per_n_bytes = C * HW * itemsize
    # 2 in + 2 out double-buffers + weights/temps must fit under vmem_limit.
    target_block_bytes = max(1 << 20, vmem_limit // 5)
    Nb = _pick_nb(N, per_n_bytes, target_block_bytes, two_cores)
    steps = pl.cdiv(N, Nb)

    cost = pl.CostEstimate(
        flops=4 * N * C * S + 2 * N * C * HW,
        transcendentals=N * (S + C),
        bytes_accessed=2 * N * C * HW * itemsize + (2 * C * S + S + C) * 4,
    )

    kernel = partial(_se_kernel, inv_hw=1.0 / float(HW))

    out = pl.pallas_call(
        kernel,
        out_shape=jax.ShapeDtypeStruct((N, C, HW), x.dtype),
        grid_spec=pltpu.PrefetchScalarGridSpec(
            num_scalar_prefetch=0,
            grid=(steps,),
            in_specs=[
                pl.BlockSpec((Nb, C, HW), lambda n: (n, 0, 0)),
                pl.BlockSpec((C, S), lambda n: (0, 0)),
                pl.BlockSpec((1, S), lambda n: (0, 0)),
                pl.BlockSpec((S, C), lambda n: (0, 0)),
                pl.BlockSpec((1, C), lambda n: (0, 0)),
            ],
            out_specs=pl.BlockSpec((Nb, C, HW), lambda n: (n, 0, 0)),
        ),
        compiler_params=pltpu.CompilerParams(
            dimension_semantics=("parallel",),
            vmem_limit_bytes=int(vmem_limit),
        ),
        cost_estimate=cost,
    )(x, w1_t, b1_r, w2_t, b2_r)

    return out.reshape(N, C, H, W)


def reference(x_nchw, w1, b1, w2, b2):
    pooled = jnp.mean(x_nchw, axis=(2, 3), keepdims=True)            # (N,C,1,1)
    p = pooled[..., 0, 0]                                            # (N,C)
    s = p @ w1.T + b1[:, 0]                                          # (N,S)
    s = s * jax.nn.sigmoid(s)
    s = s @ w2.T + b2[:, 0]                                          # (N,C)
    scale = jax.nn.sigmoid(s)
    return scale[:, :, None, None] * x_nchw


if __name__ == "__main__":
    # SqueezeExcitation(input_c=16, expand_c=32) -> squeeze_c = 16 // 4 = 4
    input_c, expand_c = 16, 32
    squeeze_c = input_c // 4
    # 14x14 spatial (HW = 196, not a multiple of 128) exercises the
    # no-padding / masked-tail-store path.
    N, H, W = 2, 14, 14

    key = jax.random.PRNGKey(0)
    kx, k1, k2, k3, k4 = jax.random.split(key, 5)

    x = jax.random.normal(kx, (N, expand_c, H, W), dtype=jnp.float32)
    # fc1: Conv2d(expand_c, squeeze_c, 1) -> weight (squeeze_c, expand_c)
    w1 = jax.random.normal(k1, (squeeze_c, expand_c), dtype=jnp.float32) * 0.1
    b1 = jax.random.normal(k2, (squeeze_c, 1), dtype=jnp.float32) * 0.1
    # fc2: Conv2d(squeeze_c, expand_c, 1) -> weight (expand_c, squeeze_c)
    w2 = jax.random.normal(k3, (expand_c, squeeze_c), dtype=jnp.float32) * 0.1
    b2 = jax.random.normal(k4, (expand_c, 1), dtype=jnp.float32) * 0.1

    out = squeeze_excitation(x, w1, b1, w2, b2)
    jax.block_until_ready(out)

    ref = reference(x, w1, b1, w2, b2)
    assert out.shape == ref.shape, "shape mismatch"
    assert jnp.allclose(out, ref, atol=1e-5, rtol=1e-5), "mismatch vs reference"

    print("KERNEL_OK")
</pallas_src>

<mosaic_0001>
module attributes {stable_mosaic.version = 11 : i64} {
  func.func @_se_kernel(%arg0: i32, %arg1: memref<1x32x196xf32, #tpu.memory_space<vmem>>, %arg2: memref<32x4xf32, #tpu.memory_space<vmem>>, %arg3: memref<1x4xf32, #tpu.memory_space<vmem>>, %arg4: memref<4x32xf32, #tpu.memory_space<vmem>>, %arg5: memref<1x32xf32, #tpu.memory_space<vmem>>, %arg6: memref<1x32x196xf32, #tpu.memory_space<vmem>>) attributes {dimension_semantics = [#tpu.dimension_semantics<parallel>], iteration_bounds = array<i64: 2>, scalar_prefetch = 0 : i64, scratch_operands = 0 : i64, tpu.core_type = #tpu.core_type<tc>, window_params = [{transform_indices = @transform_0, window_bounds = array<i64: 1, 32, 196>}, {pipeline_mode = #tpu.pipeline_mode<synchronous>, transform_indices = @transform_1, window_bounds = array<i64: 32, 4>}, {pipeline_mode = #tpu.pipeline_mode<synchronous>, transform_indices = @transform_2, window_bounds = array<i64: 1, 4>}, {pipeline_mode = #tpu.pipeline_mode<synchronous>, transform_indices = @transform_3, window_bounds = array<i64: 4, 32>}, {pipeline_mode = #tpu.pipeline_mode<synchronous>, transform_indices = @transform_4, window_bounds = array<i64: 1, 32>}, {transform_indices = @transform_5, window_bounds = array<i64: 1, 32, 196>}]} {
    %c0 = arith.constant 0 : index
    %c0_0 = arith.constant 0 : index
    %c0_1 = arith.constant 0 : index
    %0 = vector.load %arg1[%c0, %c0_0, %c0_1] : memref<1x32x196xf32, #tpu.memory_space<vmem>>, vector<1x32x196xf32>
    %cst = arith.constant dense<0.000000e+00> : vector<1x32xf32>
    %1 = vector.multi_reduction <add>, %0, %cst [2] : vector<1x32x196xf32> to vector<1x32xf32>
    %cst_2 = arith.constant 0.00510204071 : f32
    %2 = vector.broadcast %cst_2 : f32 to vector<1x32xf32>
    %3 = arith.mulf %1, %2 : vector<1x32xf32>
    %c0_3 = arith.constant 0 : index
    %c0_4 = arith.constant 0 : index
    %4 = vector.load %arg2[%c0_3, %c0_4] : memref<32x4xf32, #tpu.memory_space<vmem>>, vector<32x4xf32>
    %cst_5 = arith.constant dense<0.000000e+00> : vector<1x4xf32>
    %5 = tpu.matmul %3, %4, %cst_5 {dimension_numbers = #tpu.dot_dimension_numbers<[1], [0], [0], [1], [0, 0, 1, 1], [], []>} : vector<1x32xf32>, vector<32x4xf32>, vector<1x4xf32> -> vector<1x4xf32>
    %c0_6 = arith.constant 0 : index
    %c0_7 = arith.constant 0 : index
    %6 = vector.load %arg3[%c0_6, %c0_7] : memref<1x4xf32, #tpu.memory_space<vmem>>, vector<1x4xf32>
    %7 = arith.addf %5, %6 : vector<1x4xf32>
    %8 = arith.negf %7 : vector<1x4xf32>
    %9 = math.exp %8 : vector<1x4xf32>
    %cst_8 = arith.constant 1.000000e+00 : f32
    %10 = vector.broadcast %cst_8 : f32 to vector<1x4xf32>
    %11 = arith.addf %10, %9 : vector<1x4xf32>
    %12 = arith.divf %10, %11 : vector<1x4xf32>
    %13 = arith.mulf %7, %12 : vector<1x4xf32>
    %c0_9 = arith.constant 0 : index
    %c0_10 = arith.constant 0 : index
    %14 = vector.load %arg4[%c0_9, %c0_10] : memref<4x32xf32, #tpu.memory_space<vmem>>, vector<4x32xf32>
    %cst_11 = arith.constant dense<0.000000e+00> : vector<1x32xf32>
    %15 = tpu.matmul %13, %14, %cst_11 {dimension_numbers = #tpu.dot_dimension_numbers<[1], [0], [0], [1], [0, 0, 1, 1], [], []>} : vector<1x4xf32>, vector<4x32xf32>, vector<1x32xf32> -> vector<1x32xf32>
    %c0_12 = arith.constant 0 : index
    %c0_13 = arith.constant 0 : index
    %16 = vector.load %arg5[%c0_12, %c0_13] : memref<1x32xf32, #tpu.memory_space<vmem>>, vector<1x32xf32>
    %17 = arith.addf %15, %16 : vector<1x32xf32>
    %18 = arith.negf %17 : vector<1x32xf32>
    %19 = math.exp %18 : vector<1x32xf32>
    %cst_14 = arith.constant 1.000000e+00 : f32
    %20 = vector.broadcast %cst_14 : f32 to vector<1x32xf32>
    %21 = arith.addf %20, %19 : vector<1x32xf32>
    %22 = arith.divf %20, %21 : vector<1x32xf32>
    %23 = vector.shape_cast %22 : vector<1x32xf32> to vector<1x32x1xf32>
    %24 = vector.broadcast %23 : vector<1x32x1xf32> to vector<1x32x196xf32>
    %25 = arith.mulf %24, %0 : vector<1x32x196xf32>
    %c0_15 = arith.constant 0 : index
    %c0_16 = arith.constant 0 : index
    %c0_17 = arith.constant 0 : index
    %26 = vector.load %arg6[%c0_15, %c0_16, %c0_17] : memref<1x32x196xf32, #tpu.memory_space<vmem>>, vector<1x32x196xf32>
    tpu.vector_store %arg6[%c0_15, %c0_16, %c0_17], %25 {strides = array<i32>} : memref<1x32x196xf32, #tpu.memory_space<vmem>>, vector<1x32x196xf32>,
    return
  }
  func.func @transform_0(%arg0: i32) -> (i32, i32, i32) {
    %c0_i32 = arith.constant 0 : i32
    %c0_i32_0 = arith.constant 0 : i32
    %c0_i32_1 = arith.constant 0 : i32
    return %arg0, %c0_i32, %c0_i32_0 : i32, i32, i32
  }
  func.func @transform_1(%arg0: i32) -> (i32, i32) {
    %c0_i32 = arith.constant 0 : i32
    %c0_i32_0 = arith.constant 0 : i32
    %c0_i32_1 = arith.constant 0 : i32
    return %c0_i32, %c0_i32_0 : i32, i32
  }
  func.func @transform_2(%arg0: i32) -> (i32, i32) {
    %c0_i32 = arith.constant 0 : i32
    %c0_i32_0 = arith.constant 0 : i32
    %c0_i32_1 = arith.constant 0 : i32
    return %c0_i32, %c0_i32_0 : i32, i32
  }
  func.func @transform_3(%arg0: i32) -> (i32, i32) {
    %c0_i32 = arith.constant 0 : i32
    %c0_i32_0 = arith.constant 0 : i32
    %c0_i32_1 = arith.constant 0 : i32
    return %c0_i32, %c0_i32_0 : i32, i32
  }
  func.func @transform_4(%arg0: i32) -> (i32, i32) {
    %c0_i32 = arith.constant 0 : i32
    %c0_i32_0 = arith.constant 0 : i32
    %c0_i32_1 = arith.constant 0 : i32
    return %c0_i32, %c0_i32_0 : i32, i32
  }
  func.func @transform_5(%arg0: i32) -> (i32, i32, i32) {
    %c0_i32 = arith.constant 0 : i32
    %c0_i32_0 = arith.constant 0 : i32
    %c0_i32_1 = arith.constant 0 : i32
    return %arg0, %c0_i32, %c0_i32_0 : i32, i32, i32
  }
}

</mosaic_0001>

<bundles_post_ra>
// kernel: tpu_custom_call.1
= control target key start
LH: loop header
LB: loop body
LE: loop exit
PB: predicated region body
PF: predicated region fallthrough
CT: control target
= control target key end

     0   :  { %10 = vsyncpa [#allocation3], 0  ;;  %s1071_s0 = inlined_call_operand.hbm [shape: f32[2,32,196], index: 0, kind: input, shape index: {}]   ;;  %s1072_s1 = inlined_call_operand.vmem [shape: f32[32,4], index: 1, kind: input, shape index: {}]   ;;  %s1073_s2 = inlined_call_operand.vmem [shape: f32[1,4], index: 2, kind: input, shape index: {}]   ;;  %s1074_s3 = inlined_call_operand.vmem [shape: f32[4,32], index: 3, kind: input, shape index: {}]   ;;  %s1075_s4 = inlined_call_operand.vmem [shape: f32[1,32], index: 4, kind: input, shape index: {}]   ;;  %s1076_s5 = inlined_call_operand.hbm [shape: f32[2,32,196], index: 5, kind: output, shape index: {}]  }
   0x1   :  { %12 = vsyncpa [#allocation3 + $0x1], 0 }
   0x2   :  { %13 = vsyncpa [#allocation4], 0 }
   0x3   :  { %15 = vsyncpa [#allocation4 + $0x1], 0  ;;  %s844_s18 = smov 0   ;;  %s846_s19 = smov 0  }
   0x4   :  { %s848_s20 = smov 0   ;;  %s850_s21 = smov 0  }
   0x5 LB: > { %s865_s22 = sadd.s32 4294967295, %s803_s21   ;;  %s596_s23 = sadd.s32 4294967294, %s803_s21   ;;  %s803_s21 = sphi %s850_s21, %s1089_s21   ;;  %s799_s20 = sphi %s848_s20, %s1088_s20   ;;  %s795_s19 = sphi %s846_s19, %s1087_s19   ;;  %s791_s18 = sphi %s844_s18, %s1086_s18  }
   0x6   : > { %s869_s24 = sadd.s32 1, %s803_s21   ;;  %s28_s25 = sadd.s32 1, %s799_s20 }
   0x7   : > { %s25_s26 = ssub.s32 %s803_s21, %s869_s24  ;;  %p35_p0 = scmp.ne.s32.totalorder %s799_s20, %s795_s19 }
   0x8   : > { %p26_p1 = scmp.eq.s32.totalorder %s25_s26, 0  ;;  %p36_p2 = scmp.eq.s32.totalorder %s803_s21, 0 }
   0x9   : > { %p41_p3 = scmp.ne.s32.totalorder %s795_s19, %s791_s18  ;;  %p42_p4 = scmp.eq.s32.totalorder %s865_s22, 0 }
   0xa   : > { %s881_s27 = scalar_select %p26_p1, %s799_s20, %s28_s25  }
   0xb   : > { %p883_p5 = por %p36_p2, %p35_p0  ;;  %p887_p6 = por %p42_p4, %p41_p3 }
   0xc   : > { %p149_p7 = scmp.eq.s32.totalorder %s865_s22, 1  ;;  %p155_p8 = scmp.eq.s32.totalorder %s596_s23, 1 }
   0xd   : > { %p658_p10 = scmp.lt.s32.totalorder %s803_s21, 2  ;;  %s187_s7 = sand.u32 1, %s799_s20  }
   0xe   : > { %p894_p11 = por %p149_p7, %p35_p0  ;;  %p898_p12 = por %p155_p8, %p41_p3 }
   0xf   : > { %s615_s8 = sshll.u32 %s803_s21, 10  ;;  %s599_s9 = sshll.u32 %s187_s7, 6 }
  0x10   : > { %s1080_s30 = scalar_select %p894_p11, 1, 0 }
  0x11   : > { %s1081_s6 = scalar_select %p898_p12, 1, 0 }
  0x12   : > { %s907_s12 = scalar_lea.hbm %s1071_s0, %s615_s8  ;;  %s191_s13 = scalar_lea.vmem [#allocation2], %s599_s9 }
  0x13   : > { %s198_s14 = sshll.u32 %s191_s13, 4  ;;  %p911_p13 = pnand %p658_p10, %p883_p5  ;;  %s915_s14 = int_to_ptr.vmem [resolvable:$true] %s198_s14 }
  0x14   : > { %s917_s16 = scalar_lea.sflag [#allocation3], %s187_s7  ;;  %s707_s17 = scalar_lea.hbm %s907_s12, 1024 }
  0x15   : > { %p708_p0 = scmp.ne.s32.totalorder %s907_s12, %s707_s17  ;;  %p709_p1 = pneg %p911_p13 }
  0x16   : > { %s712_s26 = scalar_lea.hbm %s1071_s0, 2048  ;;  %p713_p4 = scmp.lt.u32.totalorder %s907_s12, %s1071_s0 }
  0x17   : > { %p710_p2 = pnand %p709_p1, %p708_p0  ;;  %p714_p5 = scmp.lt.u32.totalorder %s712_s26, %s707_s17 }
  0x18   : > { %p716_p8 = scmp.lt.u32.totalorder %s707_s17, %s907_s12 }
  0x19   : > { %p711_p3 = pneg %p710_p2  ;;  %p715_p7 = por %p714_p5, %p713_p4 }
  0x1b   : > { %p717_p10 = por %p716_p8, %p715_p7 }
  0x1d   : > { %p718_p9 = pnand %p717_p10, %p711_p3 }
  0x1f   : > { %721 = shalt.err (!%p718_p9)
}
  0x20   : > { %s722_s7 = scalar_lea.vmem %s915_s14, 1024  ;;  %s805_s9 = smov [#allocation2]  }
  0x21   : > { %p723_p0 = scmp.ne.s32.totalorder %s915_s14, %s722_s7  ;;  %s727_s10 = sshll.u32 %s805_s9, 4  ;;  %s728_s10 = int_to_ptr.vmem [resolvable:$false] %s727_s10 }
  0x22   : > { %s729_s11 = scalar_lea.vmem %s728_s10, 2048  ;;  %p730_p11 = scmp.lt.s32.totalorder %s915_s14, %s728_s10 }
  0x23   : > { %p725_p2 = pnand %p723_p0, %p709_p1  ;;  %p731_p4 = scmp.lt.s32.totalorder %s729_s11, %s722_s7 }
  0x25   : > { %p726_p12 = pneg %p725_p2  ;;  %p732_p5 = por %p731_p4, %p730_p11 }
  0x27   : > { %p733_p7 = pnand %p732_p5, %p726_p12 }
  0x29   : > { %736 = shalt.err (!%p733_p7)
}
  0x2a   : > { %s806_s13 = smov 256   ;;  %s807_s17 = smov 16  }
  0x2b   : > { %653 = dma.hbm_to_vmem [thread:$0]  (!%p911_p13), %s907_s12, 1024, %s915_s14, %s917_s16, %s806_s13, %s806_s13, %s807_s17  }
  0x2c   : > { %p602_p9 = scmp.ge.s32.totalorder %s803_s21, 1  ;;  %p206_p1 = scmp.lt.s32.totalorder %s803_s21, 3 }
  0x2e   : > { %p207_p3 = pnand %p602_p9, %p206_p1 }
  0x2f   : > { %s948_s23 = sand.u32 (!%p207_p3), 1, %s795_s19  }
  0x30   : > { %210 = sbr.rel (%p207_p3) target bundleno = 837 (0x345), region = 40  ;;  %s603_s25 = sshll.u32 (!%p207_p3), %s948_s23, 6 }
  0x31   : > { %s213_s26 = scalar_lea.sflag (!%p207_p3), [#allocation3], %s948_s23  ;;  %s216_s28 = scalar_lea.vmem (!%p207_p3), [#allocation2], %s603_s25 }
  0x37   : > { %782 = dma.done.wait (%p887_p6), %s213_s26, 1024  }
  0x38   : > { %784 = vsyncadd (%p887_p6), %s213_s26, 4294966272  ;;  %vm251_vm0 = vcmask 556032   ;;  %v958_v0 = vld [vmem:[%s216_s28] sm:$0xff]  ;;  %v960_v1 = vld [vmem:[%s216_s28 + $0x8] sm:$0xff]  ;;  %v808_v19 = vmov 0.0|0.0   ;;  %vm809_vm1 = vmmov 0   ;;  %v281_v24 = vlaneseq }
  0x39   : > { %v962_v2 = vld [vmem:[%s216_s28 + $0x20] sm:$0xff]  ;;  %v252_v3 = vsel %vm251_vm0, %v960_v1, 0.0  ;;  %v966_v4 = vld [vmem:[%s216_s28 + $0x28] sm:$0xff]  ;;  %v968_v5 = vld [vmem:[%s216_s28 + $0x10] sm:$0xff]  ;;  %640 = vmatprep.subr.bf16.mxu0 %v808_v19  ;;  %v810_v23 = vmov 0.0   ;;  %vm292_vm2 = vcmask 130112  }
  0x3a   : > { %v970_v6 = vld [vmem:[%s216_s28 + $0x18] sm:$0xff]  ;;  %v253_v7 = vadd.f32 %v252_v3, %v958_v0  ;;  %v260_v8 = vsel %vm251_vm0, %v966_v4, 0.0  ;;  %v977_v10 = vld [vmem:[%s216_s28 + $0x30] sm:$0xff]  ;;  %v272_v16 = vld [vmem:[%s1072_s1] sm:$0xff]  ;;  %632 = vmatprep.mubr.msk.f32.mxu0 %vm809_vm1, %v810_v23  ;;  %635 = vmatprep.subr.mxu1 %v810_v23  ;;  %v282_v25 = vand.u32 127, %v281_v24  ;;  %v284_v26 = vshrl.u32 %v281_v24, 7 }
  0x3b   : > { %v256_v9 = vsel %vm251_vm0, %v970_v6, 0.0  ;;  %v979_v11 = vld [vmem:[%s216_s28 + $0x38] sm:$0xff]  ;;  %v261_v12 = vadd.f32 %v260_v8, %v962_v2  ;;  %v273_v17 = vld [vmem:[%s1072_s1 + $0x8] sm:$0xff]  ;;  %v274_v20 = vld [vmem:[%s1072_s1 + $0x10] sm:$0xff]  ;;  %637 = vmatprep.mubr.msk.f32.mxu1 %vm809_vm1, %v810_v23  ;;  %vm299_vm3 = vcmask 195712   ;;  %vm306_vm4 = vcmask 261312  }
  0x3c   : > { %v264_v13 = vsel %vm251_vm0, %v979_v11, 0.0  ;;  %254 = vadd.xlane.f32.xlu0 %v253_v7  ;;  %v257_v14 = vadd.f32 %v256_v9, %v968_v5  ;;  %v641_v18 = vpack.c.bf16 %v273_v17, %v272_v16  ;;  %v275_v21 = vld [vmem:[%s1072_s1 + $0x18] sm:$0xff]  ;;  %v287_v27 = vadd.s32 4294967288, %v282_v25  ;;  %v388_v49 = vld [vmem:[%s1074_s3] sm:$0xf]  ;;  %s242_s29 = scalar_lea.vmem [#allocation5], %s603_s25 }
  0x3d   : > { %262 = vadd.xlane.f32.xlu1 %v261_v12  ;;  %v265_v15 = vadd.f32 %v264_v13, %v977_v10  ;;  %v644_v22 = vpack.c.bf16 %v275_v21, %v274_v20  ;;  %v294_v29 = vadd.s32 4294967280, %v282_v25  ;;  %v301_v30 = vadd.s32 4294967272, %v282_v25  ;;  %v276_v50 = vld [vmem:[%s1073_s2] sm:$0x1]  ;;  %s523_s12 = sshll.u32 %s242_s29, 4  ;;  %s616_s14 = sshll.u32 %s865_s22, 10  ;;  %s1018_s12 = int_to_ptr.vmem [resolvable:$true] %s523_s12 }
  0x3e   : > { %642 = vmatpush3.bf16.msra.mxu0 %v641_v18  ;;  %v285_v32 = vsub.s32 %v282_v25, %v284_v26  ;;  %v290_v34 = vsub.s32 %v287_v27, %v284_v26  ;;  %vm308_vm5 = vcmask 261120   ;;  %vm394_vm6 = vcmask 1043456   ;;  %v389_v59 = vld [vmem:[%s1075_s4] sm:$0x1]  ;;  %s1024_s16 = scalar_lea.hbm %s1076_s5, %s616_s14  ;;  %s510_s22 = scalar_lea.sflag [#allocation4], %s948_s23 }
  0x3f   : > { %643 = vmatprep.subr.bf16.mxu0 %v808_v19  ;;  %v297_v35 = vsub.s32 %v294_v29, %v284_v26  ;;  %v304_v38 = vsub.s32 %v301_v30, %v284_v26  ;;  %636 = vmatpush3.msk.msra.mxu1 %vm394_vm6, %v388_v49  ;;  %vm390_vm7 = vcmask 31744   ;;  %v476_v8 = vsub.s32 0, %v284_v26  ;;  %s737_s8 = scalar_lea.vmem %s1018_s12, 1024  ;;  %p1083_p11 = scmp.ne.s32.totalorder %s1080_s30, 0 }
  0x40   : > { %258 = vadd.xlane.f32.xlu0 %v257_v14  ;;  %p738_p6 = scmp.ne.s32.totalorder %s1018_s12, %s737_s8  ;;  %s811_s7 = smov [#allocation5]  }
  0x41   : > { %266 = vadd.xlane.f32.xlu1 %v265_v15  ;;  %s741_s9 = sshll.u32 %s811_s7, 4  ;;  %s742_s9 = int_to_ptr.vmem [resolvable:$false] %s741_s9 }
  0x42   : > { %645 = vmatpush3.bf16.msra.mxu0 %v644_v22  ;;  %p739_p12 = pnand %p738_p6, %p1083_p11  ;;  %s743_s10 = scalar_lea.vmem %s742_s9, 2048 }
  0x43   : > { %p744_p8 = scmp.lt.s32.totalorder %s1018_s12, %s742_s9  ;;  %p745_p10 = scmp.lt.s32.totalorder %s743_s10, %s737_s8 }
  0x44   : > { %p740_p13 = pneg %p739_p12 }
  0x45   : > { %p746_p0 = por %p745_p10, %p744_p8 }
  0x47   : > { %p747_p2 = pnand %p746_p0, %p740_p13 }
  0xc9   : > { %v255_v28 = vpop.xlane.xlu0 %254 }
  0xca   : > { %v263_v31 = vpop.xlane.xlu1 %262  ;;  %v268_v33 = vmul.f32 0.0051020407, %v255_v28 }
  0xcb   : > { %v270_v36 = vmul.f32 0.0051020407, %v263_v31 }
  0xcc   : > { %v286_v42 = vrot.slane %v268_v33, %v285_v32 }
  0xcd   : > { %v259_v37 = vpop.xlane.xlu0 %258  ;;  %v298_v44 = vrot.slane %v270_v36, %v297_v35 }
  0xce   : > { %v269_v39 = vmul.f32 0.0051020407, %v259_v37  ;;  %v267_v40 = vpop.xlane.xlu1 %266 }
  0xcf   : > { %v271_v41 = vmul.f32 0.0051020407, %v267_v40 }
  0xd0   : > { %v291_v43 = vrot.slane %v269_v39, %v290_v34 }
  0xd1   : > { %v305_v45 = vrot.slane %v271_v41, %v304_v38 }
  0xd2   : > { %v293_v46 = vsel %vm292_vm2, %v291_v43, %v286_v42 }
  0xd3   : > { %v300_v47 = vsel %vm299_vm3, %v298_v44, %v293_v46 }
  0xd4   : > { %v307_v48 = vsel %vm306_vm4, %v305_v45, %v300_v47 }
  0xd5   : > { %633 = vmatmul.mubr.msk.f32.vlgmr.msra.gmra.mrb[0].mxu0 %vm308_vm5, %v307_v48 }
 0x1a8   : > { %v377_v51 = vpop.f32.mrb[0].mxu0 }
 0x1a9   : > { %v378_v52 = vadd.f32 %v377_v51, %v276_v50  ;;  %v634_v53 = vpop.f32.mrb[1].mxu0 }
 0x1ab   : > { %v606_v54 = vmul.f32 -1.442695, %v378_v52 }
 0x1ad   : > { %699 = vpow2.f32 %v606_v54 }
 0x1b7   : > { %v700_v55 = vpop.eup %699 }
 0x1b8   : > { %v384_v56 = vadd.f32 1.0, %v700_v55 }
 0x1ba   : > { %701 = vrcp.f32 %v384_v56 }
 0x1c4   : > { %v702_v57 = vpop.eup %701 }
 0x1c5   : > { %v387_v58 = vmul.f32 %v702_v57, %v378_v52 }
 0x1c7   : > { %638 = vmatmul.mubr.msk.f32.vlgmr.msra.gmra.mrb[0].mxu1 %vm390_vm7, %v387_v58 }
 0x29a   : > { %v464_v60 = vpop.f32.mrb[0].mxu1 }
 0x29b   : > { %v465_v61 = vadd.f32 %v464_v60, %v389_v59  ;;  %v639_v62 = vpop.f32.mrb[1].mxu1 }
 0x29d   : > { %v609_v63 = vmul.f32 -1.442695, %v465_v61 }
 0x29f   : > { %703 = vpow2.f32 %v609_v63 }
 0x2a9   : > { %v704_v3 = vpop.eup %703 }
 0x2aa   : > { %v471_v7 = vadd.f32 1.0, %v704_v3 }
 0x2ac   : > { %705 = vrcp.f32 %v471_v7 }
 0x2b6   : > { %v706_v9 = vpop.eup %705 }
 0x2b7   : > { %v477_v12 = vrot.slane %v706_v9, %v476_v8 }
 0x2b9   : > { %483 = vbcast.lane.b32.xlu1 %v477_v12, 264  ;;  %479 = vbcast.lane.b32.xlu0 %v477_v12, 256 }
 0x2bd   : > { %487 = vbcast.lane.b32.xlu1 %v477_v12, 272 }
 0x2c1   : > { %491 = vbcast.lane.b32.xlu1 %v477_v12, 280 }
 0x32b   : > { %v484_v13 = vpop.permute.xlu1 %483  ;;  %v480_v14 = vpop.permute.xlu0 %479 }
 0x32c   : > { %v495_v15 = vmul.f32 %v484_v13, %v968_v5  ;;  %v496_v16 = vmul.f32 %v484_v13, %v970_v6  ;;  %v493_v17 = vmul.f32 %v480_v14, %v958_v0  ;;  %v494_v18 = vmul.f32 %v480_v14, %v960_v1 }
 0x32e   : > { %503 = vst [vmem:[%s242_s29 + $0x10] sm:$0xff] %v495_v15  ;;  %504 = vst.msk [vmem:[%s242_s29 + $0x18] sm:$0xff] %vm251_vm0, %v496_v16 }
 0x32f   : > { %501 = vst [vmem:[%s242_s29] sm:$0xff] %v493_v17  ;;  %502 = vst.msk [vmem:[%s242_s29 + $0x8] sm:$0xff] %vm251_vm0, %v494_v18  ;;  %v488_v19 = vpop.permute.xlu1 %487 }
 0x330   : > { %v497_v5 = vmul.f32 %v488_v19, %v962_v2  ;;  %v498_v6 = vmul.f32 %v488_v19, %v966_v4 }
 0x332   : > { %505 = vst [vmem:[%s242_s29 + $0x20] sm:$0xff] %v497_v5  ;;  %506 = vst.msk [vmem:[%s242_s29 + $0x28] sm:$0xff] %vm251_vm0, %v498_v6 }
 0x333   : > { %v492_v0 = vpop.permute.xlu1 %491 }
 0x334   : > { %v499_v1 = vmul.f32 %v492_v0, %v977_v10  ;;  %v500_v2 = vmul.f32 %v492_v0, %v979_v11 }
 0x336   : > { %507 = vst [vmem:[%s242_s29 + $0x30] sm:$0xff] %v499_v1  ;;  %508 = vst.msk [vmem:[%s242_s29 + $0x38] sm:$0xff] %vm251_vm0, %v500_v2 }
 0x337   : > { %750 = shalt.err (!%p747_p2)
}
 0x338   : > { %s751_s11 = scalar_lea.hbm %s1024_s16, 1024  ;;  %s755_s26 = scalar_lea.hbm %s1076_s5, 2048 }
 0x339   : > { %p752_p4 = scmp.ne.s32.totalorder %s1024_s16, %s751_s11  ;;  %p756_p9 = scmp.lt.u32.totalorder %s1024_s16, %s1076_s5 }
 0x33a   : > { %p757_p1 = scmp.lt.u32.totalorder %s755_s26, %s751_s11  ;;  %p759_p6 = scmp.lt.u32.totalorder %s751_s11, %s1024_s16 }
 0x33b   : > { %p753_p5 = pnand %p752_p4, %p1083_p11 }
 0x33c   : > { %p758_p3 = por %p757_p1, %p756_p9 }
 0x33d   : > { %p754_p7 = pneg %p753_p5 }
 0x33e   : > { %p760_p12 = por %p759_p6, %p758_p3 }
 0x340   : > { %p761_p13 = pnand %p760_p12, %p754_p7 }
 0x342   : > { %764 = shalt.err (!%p761_p13)
}
 0x343   : > { %s812_s14 = smov 256   ;;  %s813_s25 = smov 16  }
 0x344   : > { %648 = dma.vmem_to_hbm [thread:$0]  (%p1083_p11), %s1018_s12, 1024, %s1024_s16, %s510_s22, %s812_s14, %s812_s14, %s813_s25  }
 0x345 PF: > { %s538_s15 = sand.u32 1, %s791_s18   ;;  %p1084_p8 = scmp.ne.s32.totalorder %s1081_s6, 0 }
 0x346   : > { %p1085_p10 = scmp.ge.s32.totalorder %s803_s21, 2  ;;  %s539_s8 = scalar_lea.sflag [#allocation4], %s538_s15 }
 0x348   : > { %p655_p0 = pnand %p1085_p10, %p1084_p8 }
 0x34a   : > { %786 = dma.done.wait (!%p655_p0), %s539_s8, 1024  }
 0x34b   : > { %788 = vsyncadd (!%p655_p0), %s539_s8, 4294966272  ;;  %p18_p2 = scmp.ge.s32.totalorder %s869_s24, 4   ;;  %s1086_s18 = smov %s795_s19 }
 0x34c   : > { %s1087_s19 = smov %s799_s20  ;;  %s1088_s20 = smov %s881_s27 }
 0x34d   : > { %s1089_s21 = smov %s869_s24  ;;  %20 = sbr.rel (!%p18_p2) target bundleno = 5 (0x5), region = 85 }
 0x354   :  { %544 = vsyncpa [#allocation3], 1 }
 0x355   :  { %546 = vsyncpa [#allocation3 + $0x1], 1 }
 0x356   :  { %547 = vsyncpa [#allocation4], 1 }
 0x357   :  { %549 = vsyncpa [#allocation4 + $0x1], 1 }

</bundles_post_ra>
